<compile_context>
chip_gen: v5e
topology: v5e:2x2
jax: 0.10.0
libtpu: 0.0.40
codegen_flags: <defaults>
</compile_context>

<pallas_src>
import functools
import math

import jax
import jax.numpy as jnp
import numpy as np
from jax.experimental import pallas as pl
from jax.experimental.pallas import tpu as pltpu


# --------------------------------------------------------------------------
# Compare-exchange sorting networks (descending sort of n same-shape arrays).
# --------------------------------------------------------------------------
_FIXED_NETS = {
    1: (),
    2: ((0, 1),),
    3: ((0, 1), (1, 2), (0, 1)),
    4: ((0, 1), (2, 3), (0, 2), (1, 3), (1, 2)),    # optimal: 5 comparators
}


def _sorting_network(n):
    if n in _FIXED_NETS:
        return _FIXED_NETS[n]
    net = []
    for rnd in range(n):                 # odd-even transposition fallback
        for i in range(rnd % 2, n - 1, 2):
            net.append((i, i + 1))
    return tuple(net)


# --------------------------------------------------------------------------
# In-kernel entmax-1.5 over the *list index* of `cols` (a static, small list
# of equal-shape f32 arrays).  Faithful to entmax.Entmax15Function.forward,
# fully element-wise, so it is batched over whatever shape each entry has.
# --------------------------------------------------------------------------
def _entmax15_list(cols):
    n = len(cols)
    m = cols[0]
    for c in cols[1:]:
        m = jnp.maximum(m, c)
    z = [(c - m) * 0.5 for c in cols]                      # (x - max) / 2

    zs = list(z)
    for i, j in _sorting_network(n):                       # descending sort
        hi = jnp.maximum(zs[i], zs[j])
        lo = jnp.minimum(zs[i], zs[j])
        zs[i], zs[j] = hi, lo

    csum = jnp.zeros_like(zs[0])
    csumsq = jnp.zeros_like(zs[0])
    taus = []
    for kk in range(1, n + 1):
        vv = zs[kk - 1]
        csum = csum + vv
        csumsq = csumsq + vv * vv
        mean = csum / float(kk)
        mean_sq = csumsq / float(kk)
        ss = float(kk) * (mean_sq - mean * mean)
        delta = (1.0 - ss) / float(kk)
        taus.append(mean - jnp.sqrt(jnp.maximum(delta, 0.0)))

    support = jnp.zeros_like(zs[0])
    for kk in range(n):
        support = support + (taus[kk] <= zs[kk]).astype(jnp.float32)

    tau_star = jnp.zeros_like(zs[0])
    for kk in range(n):
        tau_star = tau_star + jnp.where(support == float(kk + 1), taus[kk], 0.0)

    return [jnp.square(jnp.maximum(zc - tau_star, 0.0)) for zc in z]


# --------------------------------------------------------------------------
# Pallas kernel: one batch chunk (cb elements) per grid step.
# --------------------------------------------------------------------------
def _cross_attn_kernel(x_ref, y_ref, wc_ref, wq_ref, wkv_ref, bias_ref,
                       segsum_ref, repat_ref, colsum_ref, o_ref, *, heads):
    cb, T, E = x_ref.shape
    out_T = wc_ref.shape[1]
    H = heads
    HE = H * E
    f32 = jnp.float32

    # 1x1 conv over the T axis, batched over the cb batch elements (O(cb)).
    x3 = x_ref[...]                                           # (cb, T, E) bf16
    xc3 = jax.lax.dot_general(
        wc_ref[...], x3,
        dimension_numbers=(((2,), (1,)), ((0,), (0,))),
        preferred_element_type=f32)                           # (cb, out_T, E)
    xc2 = xc3.reshape(cb * out_T, E).astype(jnp.bfloat16)     # rows = (c, o)

    bias = bias_ref[...]                                      # (R, 3*HE) f32

    # Projections.  The weights are stored with replicated columns, so the
    # matmuls emit the HE-wide (head x head x per-dim) pair layout directly:
    #   q_rep[:, h1*E + h2*pd + d] = q[:, h1*pd + d]
    #   k_til[:, h1*E + h2*pd + d] = k[:, h2*pd + d]
    #   v_rep[:, h2*E + h1*pd + d] = v[:, h2*pd + d]
    q_rep = jnp.dot(y_ref[...], wq_ref[...],
                    preferred_element_type=f32) + bias[:, :HE]          # (R, HE)
    kv = jnp.dot(xc2, wkv_ref[...],
                 preferred_element_type=f32) + bias[:, HE:]             # (R, 2HE)
    k_til = kv[:, :HE]
    v_rep = kv[:, HE:]

    # scores[r, h2*H + h1] = <q_h1, k_h2> / sqrt(E): one full-width product
    # plus a constant f32 segment-sum matmul on the MXU (no XLU reduces).
    prod = q_rep * k_til
    scores = jnp.dot(prod, segsum_ref[...],
                     preferred_element_type=f32)              # (R, H*H) f32

    # entmax-1.5 over the key-head axis, batched over (row, query head).
    attn = _entmax15_list(
        [scores[:, h2 * H:(h2 + 1) * H] for h2 in range(H)])
    attn_cat = jnp.concatenate(attn, axis=-1)                 # (R, H*H)

    # out[:, h1*pd+d] = sum_h2 attn[h2][:, h1] * v[:, h2*pd+d] — again as a
    # full-width product plus a constant segment-sum matmul.
    a_rep = jnp.dot(attn_cat, repat_ref[...],
                    preferred_element_type=f32)               # (R, HE)
    out = jnp.dot(a_rep * v_rep, colsum_ref[...],
                  preferred_element_type=f32)                 # (R, E)

    o_ref[...] = out.astype(o_ref.dtype)


# --------------------------------------------------------------------------
# Wrapper: chunk sizing, parameter folding, pallas_call.
# --------------------------------------------------------------------------
def _round_up(x, m):
    return -(-x // m) * m


def _tpu_vmem_budget_and_cores():
    budget, cores = 16 << 20, 1
    try:
        info = pltpu.get_tpu_info()
        cap = getattr(info, "vmem_capacity_bytes", None)
        if cap:
            budget = max(8 << 20, min(24 << 20, int(cap) // 4))
        for name in ("num_cores", "core_count", "num_tensorcores",
                     "tensorcore_count"):
            v = getattr(info, name, None)
            if v:
                cores = int(v)
                break
    except Exception:
        pass
    return budget, cores


def _pick_batch_block(C, T, T_y, E, heads, budget, cores):
    # Flattened-row blocks (cb*T_y rows) are kept 16-aligned so both bf16 and
    # f32 blocks satisfy the sublane tiling rules.
    row_align = 16
    cb_align = row_align // math.gcd(T_y, row_align)
    HE = heads * E

    def vmem_est(cb):
        r = cb * T_y
        return (2 * cb * T * E * 2          # x block (bf16, double buffered)
                + 2 * r * E * 2             # y block
                + 2 * r * E * 4             # output block (f32)
                + 2 * r * 3 * HE * 4        # bias slab
                + r * 8 * HE * 4)           # f32 intermediates (q/kv/prod/..)

    cb_cap = max(cb_align, (1024 // max(T_y, 1)) // cb_align * cb_align)
    cb_cap = min(cb_cap, _round_up(C, cb_align))
    cb = cb_align
    while cb + cb_align <= cb_cap and vmem_est(cb + cb_align) <= budget:
        cb += cb_align

    # Multi-TensorCore parts (v7x): keep >= num_cores parallel grid steps when
    # the batch allows it.  Single-core parts never shrink (extra steps there
    # are pure ~0.35us overhead).
    if cores >= 2 and C >= 2 * cb_align:
        while _round_up(C, cb) // cb < cores and cb > cb_align:
            cb = max(cb_align, (cb // 2) // cb_align * cb_align)
    return cb


def cross_attention_pallas(x_en, y_de, params, heads):
    C, T, E = x_en.shape
    Cy, T_y, Ey = y_de.shape
    assert C == Cy and E == Ey and E % heads == 0
    out_T = params["conv_w"].shape[0]
    # queries @ keys^T in the reference broadcasts (C, T_y, ...) against
    # (C, out_T, ...); like the PyTorch module we require them equal.
    assert out_T == T_y

    H = heads
    pd = E // H
    HE = H * E
    f32, bf16 = jnp.float32, jnp.bfloat16

    budget, cores = _tpu_vmem_budget_and_cores()
    cb = _pick_batch_block(C, T, T_y, E, heads, budget, cores)
    C_pad = _round_up(C, cb)
    grid = (C_pad // cb,)

    # ---- parameter folding (one-off, wrapper-side) --------------------------
    wq_bd = jnp.kron(jnp.eye(H, dtype=f32), params["wq"].astype(f32).T)  # (E,E)
    wk_bd = jnp.kron(jnp.eye(H, dtype=f32), params["wk"].astype(f32).T)
    wv_bd = jnp.kron(jnp.eye(H, dtype=f32), params["wv"].astype(f32).T)
    bq_bd = jnp.tile(params["bq"].astype(f32), H)                        # (E,)
    bk_bd = jnp.tile(params["bk"].astype(f32), H)
    bv_bd = jnp.tile(params["bv"].astype(f32), H)

    # pair-lane index maps: lane j = outer*H*pd + inner*pd + d
    jj = np.arange(HE)
    outer = jj // (H * pd)
    inner = (jj // pd) % H
    dd = jj % pd
    col_outer = outer * pd + dd
    col_inner = inner * pd + dd

    wq_rep = wq_bd[:, col_outer]                                         # (E, HE)
    wk_til = wk_bd[:, col_inner]
    wv_rep = wv_bd[:, col_outer]
    wkv_big = jnp.concatenate([wk_til, wv_rep], axis=1)                  # (E, 2HE)

    bq_rep = bq_bd[col_outer]
    bkv_rep = jnp.concatenate([bk_bd[col_inner], bv_bd[col_outer]])

    # 1x1 conv weight (broadcast over the chunk) + its bias folded through K/V
    wc = params["conv_w"].reshape(out_T, T).astype(f32)
    wc3 = jnp.broadcast_to(wc[None, :, :], (cb, out_T, T))
    bc = params["conv_b"].astype(f32)
    bias_kv = bc[:, None] * jnp.sum(wkv_big, axis=0)[None, :] + bkv_rep[None, :]
    bias_q = jnp.broadcast_to(bq_rep[None, :], (out_T, HE))
    bias_all = jnp.tile(jnp.concatenate([bias_q, bias_kv], axis=1), (cb, 1))
    # bias_all: (cb*T_y, 3*HE) f32, fetched once (constant index map)

    # constant 0/1 segment matrices; 1/sqrt(E) folded into the f32 score sum
    inv_scale = 1.0 / float(E) ** 0.5
    segsum = np.zeros((HE, H * H), np.float32)
    segsum[jj, inner * H + outer] = inv_scale
    repat = np.zeros((H * H, HE), np.float32)
    repat[outer * H + inner, jj] = 1.0
    colsum = np.zeros((HE, E), np.float32)
    colsum[jj, col_inner] = 1.0

    # ---- activations: zero-pad the batch, cast to bf16 wrapper-side ---------
    if C_pad != C:
        padC = ((0, C_pad - C), (0, 0), (0, 0))
        x_en = jnp.pad(x_en, padC)
        y_de = jnp.pad(y_de, padC)
    x3 = x_en.astype(bf16)                                   # (C_pad, T, E)
    y2 = y_de.reshape(C_pad * T_y, E).astype(bf16)           # (C_pad*T_y, E)

    kernel = functools.partial(_cross_attn_kernel, heads=heads)
    const2 = lambda c: (0, 0)

    out2 = pl.pallas_call(
        kernel,
        out_shape=jax.ShapeDtypeStruct((C_pad * T_y, E), x_en.dtype),
        grid_spec=pltpu.PrefetchScalarGridSpec(
            num_scalar_prefetch=0,
            grid=grid,
            in_specs=[
                pl.BlockSpec((cb, T, E), lambda c: (c, 0, 0)),       # x
                pl.BlockSpec((cb * T_y, E), lambda c: (c, 0)),       # y
                pl.BlockSpec((cb, out_T, T), lambda c: (0, 0, 0)),   # conv w
                pl.BlockSpec((E, HE), const2),                       # Wq (rep)
                pl.BlockSpec((E, 2 * HE), const2),                   # Wk|Wv
                pl.BlockSpec((cb * T_y, 3 * HE), const2),            # biases
                pl.BlockSpec((HE, H * H), const2),                   # score sum
                pl.BlockSpec((H * H, HE), const2),                   # attn rep
                pl.BlockSpec((HE, E), const2),                       # value sum
            ],
            out_specs=pl.BlockSpec((cb * T_y, E), lambda c: (c, 0)),
        ),
        compiler_params=pltpu.CompilerParams(
            dimension_semantics=("parallel",),
            vmem_limit_bytes=32 * 1024 * 1024),
    )(x3, y2,
      wc3.astype(bf16), wq_rep.astype(bf16), wkv_big.astype(bf16),
      bias_all,
      jnp.asarray(segsum), jnp.asarray(repat), jnp.asarray(colsum))

    return out2.reshape(C_pad, T_y, E)[:C]


# --------------------------------------------------------------------------
# Pure-JAX reference (mirrors the PyTorch forward, incl. exact entmax-1.5).
# --------------------------------------------------------------------------
def _entmax15_ref(x):
    m = jnp.max(x, axis=-1, keepdims=True)
    z = (x - m) / 2.0
    zsrt = -jnp.sort(-z, axis=-1)
    n = z.shape[-1]
    rho = jnp.arange(1, n + 1, dtype=z.dtype)
    mean = jnp.cumsum(zsrt, axis=-1) / rho
    mean_sq = jnp.cumsum(zsrt * zsrt, axis=-1) / rho
    ss = rho * (mean_sq - mean * mean)
    delta = (1.0 - ss) / rho
    tau = mean - jnp.sqrt(jnp.maximum(delta, 0.0))
    support = jnp.sum((tau <= zsrt).astype(jnp.int32), axis=-1, keepdims=True)
    tau_star = jnp.take_along_axis(tau, support - 1, axis=-1)
    return jnp.maximum(z - tau_star, 0.0) ** 2


def cross_attention_ref(x_en, y_de, params, heads):
    C, T, E = x_en.shape
    _, T_y, _ = y_de.shape
    pd = E // heads
    out_T = params["conv_w"].shape[0]
    hp = jax.lax.Precision.HIGHEST
    x = x_en.reshape(C, T, heads, pd)
    wc = params["conv_w"].reshape(out_T, T)
    xc = jnp.einsum("ot,cthd->cohd", wc, x, precision=hp) \
        + params["conv_b"][None, :, None, None]
    y = y_de.reshape(C, T_y, heads, pd)
    q = jnp.einsum("cthd,ed->cthe", y, params["wq"], precision=hp) + params["bq"]
    k = jnp.einsum("cthd,ed->cthe", xc, params["wk"], precision=hp) + params["bk"]
    v = jnp.einsum("cthd,ed->cthe", xc, params["wv"], precision=hp) + params["bv"]
    scores = jnp.einsum("cthd,ctgd->cthg", q, k, precision=hp) / (E ** 0.5)
    attn = _entmax15_ref(scores)
    out = jnp.einsum("cthg,ctgd->cthd", attn, v, precision=hp)
    return out.reshape(C, T_y, heads * pd)


if __name__ == "__main__":
    # small shapes: embed_size=32, heads=4 (per_dim=8), T=16, T_y=out_T_dim=8, C=2
    C, T, T_y, heads, pd = 2, 16, 8, 4, 8
    E = heads * pd
    out_T = T_y

    key = jax.random.PRNGKey(0)
    keys = jax.random.split(key, 10)

    def u(k, shape, fan_in):
        b = 1.0 / (fan_in ** 0.5)
        return jax.random.uniform(k, shape, jnp.float32, -b, b)

    x_en = jax.random.normal(keys[0], (C, T, E), jnp.float32)
    y_de = jax.random.normal(keys[1], (C, T_y, E), jnp.float32)

    params = dict(
        wq=u(keys[2], (pd, pd), pd), bq=u(keys[3], (pd,), pd),
        wk=u(keys[4], (pd, pd), pd), bk=u(keys[5], (pd,), pd),
        wv=u(keys[6], (pd, pd), pd), bv=u(keys[7], (pd,), pd),
        conv_w=u(keys[8], (out_T, T, 1, 1), T), conv_b=u(keys[9], (out_T,), T),
    )

    out = cross_attention_pallas(x_en, y_de, params, heads)
    out = jax.block_until_ready(out)

    ref = cross_attention_ref(x_en, y_de, params, heads)
    assert out.shape == (C, T_y, E)
    assert bool(jnp.all(jnp.isfinite(out)))
    # looser tolerance reflects bf16 MXU operands (f32 accumulation, f32 entmax)
    if not jnp.allclose(out, ref, rtol=2e-2, atol=2e-2):
        raise AssertionError("Pallas kernel does not match reference")

    print("KERNEL_OK")
</pallas_src>

<mosaic_0001>
module attributes {stable_mosaic.version = 11 : i64} {
  func.func @_cross_attn_kernel(%arg0: i32, %arg1: memref<2x16x32xbf16, #tpu.memory_space<vmem>>, %arg2: memref<16x32xbf16, #tpu.memory_space<vmem>>, %arg3: memref<2x8x16xbf16, #tpu.memory_space<vmem>>, %arg4: memref<32x128xbf16, #tpu.memory_space<vmem>>, %arg5: memref<32x256xbf16, #tpu.memory_space<vmem>>, %arg6: memref<16x384xf32, #tpu.memory_space<vmem>>, %arg7: memref<128x16xf32, #tpu.memory_space<vmem>>, %arg8: memref<16x128xf32, #tpu.memory_space<vmem>>, %arg9: memref<128x32xf32, #tpu.memory_space<vmem>>, %arg10: memref<16x32xf32, #tpu.memory_space<vmem>>) attributes {dimension_semantics = [#tpu.dimension_semantics<parallel>], iteration_bounds = array<i64: 1>, scalar_prefetch = 0 : i64, scratch_operands = 0 : i64, tpu.core_type = #tpu.core_type<tc>, window_params = [{transform_indices = @transform_0, window_bounds = array<i64: 2, 16, 32>}, {transform_indices = @transform_1, window_bounds = array<i64: 16, 32>}, {pipeline_mode = #tpu.pipeline_mode<synchronous>, transform_indices = @transform_2, window_bounds = array<i64: 2, 8, 16>}, {pipeline_mode = #tpu.pipeline_mode<synchronous>, transform_indices = @transform_3, window_bounds = array<i64: 32, 128>}, {pipeline_mode = #tpu.pipeline_mode<synchronous>, transform_indices = @transform_4, window_bounds = array<i64: 32, 256>}, {pipeline_mode = #tpu.pipeline_mode<synchronous>, transform_indices = @transform_5, window_bounds = array<i64: 16, 384>}, {pipeline_mode = #tpu.pipeline_mode<synchronous>, transform_indices = @transform_6, window_bounds = array<i64: 128, 16>}, {pipeline_mode = #tpu.pipeline_mode<synchronous>, transform_indices = @transform_7, window_bounds = array<i64: 16, 128>}, {pipeline_mode = #tpu.pipeline_mode<synchronous>, transform_indices = @transform_8, window_bounds = array<i64: 128, 32>}, {transform_indices = @transform_9, window_bounds = array<i64: 16, 32>}]} {
    %c0 = arith.constant 0 : index
    %c0_0 = arith.constant 0 : index
    %c0_1 = arith.constant 0 : index
    %0 = vector.load %arg1[%c0, %c0_0, %c0_1] : memref<2x16x32xbf16, #tpu.memory_space<vmem>>, vector<2x16x32xbf16>
    %c0_2 = arith.constant 0 : index
    %c0_3 = arith.constant 0 : index
    %c0_4 = arith.constant 0 : index
    %1 = vector.load %arg3[%c0_2, %c0_3, %c0_4] : memref<2x8x16xbf16, #tpu.memory_space<vmem>>, vector<2x8x16xbf16>
    %cst = arith.constant dense<0.000000e+00> : vector<2x8x32xf32>
    %2 = tpu.matmul %1, %0, %cst {dimension_numbers = #tpu.dot_dimension_numbers<[2], [1], [1], [2], [0, 0, 0, 1, 1, 2], [0], [0]>} : vector<2x8x16xbf16>, vector<2x16x32xbf16>, vector<2x8x32xf32> -> vector<2x8x32xf32>
    %3 = vector.shape_cast %2 : vector<2x8x32xf32> to vector<16x32xf32>
    %4 = arith.truncf %3 : vector<16x32xf32> to vector<16x32xbf16>
    %c0_5 = arith.constant 0 : index
    %c0_6 = arith.constant 0 : index
    %5 = vector.load %arg6[%c0_5, %c0_6] : memref<16x384xf32, #tpu.memory_space<vmem>>, vector<16x384xf32>
    %c0_7 = arith.constant 0 : index
    %c0_8 = arith.constant 0 : index
    %6 = vector.load %arg2[%c0_7, %c0_8] : memref<16x32xbf16, #tpu.memory_space<vmem>>, vector<16x32xbf16>
    %c0_9 = arith.constant 0 : index
    %c0_10 = arith.constant 0 : index
    %7 = vector.load %arg4[%c0_9, %c0_10] : memref<32x128xbf16, #tpu.memory_space<vmem>>, vector<32x128xbf16>
    %cst_11 = arith.constant dense<0.000000e+00> : vector<16x128xf32>
    %8 = tpu.matmul %6, %7, %cst_11 {dimension_numbers = #tpu.dot_dimension_numbers<[1], [0], [0], [1], [0, 0, 1, 1], [], []>} : vector<16x32xbf16>, vector<32x128xbf16>, vector<16x128xf32> -> vector<16x128xf32>
    %9 = vector.extract_strided_slice %5 {offsets = [0, 0], sizes = [16, 128], strides = [1, 1]} : vector<16x384xf32> to vector<16x128xf32>
    %10 = arith.addf %8, %9 : vector<16x128xf32>
    %c0_12 = arith.constant 0 : index
    %c0_13 = arith.constant 0 : index
    %11 = vector.load %arg5[%c0_12, %c0_13] : memref<32x256xbf16, #tpu.memory_space<vmem>>, vector<32x256xbf16>
    %cst_14 = arith.constant dense<0.000000e+00> : vector<16x256xf32>
    %12 = tpu.matmul %4, %11, %cst_14 {dimension_numbers = #tpu.dot_dimension_numbers<[1], [0], [0], [1], [0, 0, 1, 1], [], []>} : vector<16x32xbf16>, vector<32x256xbf16>, vector<16x256xf32> -> vector<16x256xf32>
    %13 = vector.extract_strided_slice %5 {offsets = [0, 128], sizes = [16, 256], strides = [1, 1]} : vector<16x384xf32> to vector<16x256xf32>
    %14 = arith.addf %12, %13 : vector<16x256xf32>
    %15 = vector.extract_strided_slice %14 {offsets = [0, 0], sizes = [16, 128], strides = [1, 1]} : vector<16x256xf32> to vector<16x128xf32>
    %16 = vector.extract_strided_slice %14 {offsets = [0, 128], sizes = [16, 128], strides = [1, 1]} : vector<16x256xf32> to vector<16x128xf32>
    %17 = arith.mulf %10, %15 : vector<16x128xf32>
    %c0_15 = arith.constant 0 : index
    %c0_16 = arith.constant 0 : index
    %18 = vector.load %arg7[%c0_15, %c0_16] : memref<128x16xf32, #tpu.memory_space<vmem>>, vector<128x16xf32>
    %cst_17 = arith.constant dense<0.000000e+00> : vector<16x16xf32>
    %19 = tpu.matmul %17, %18, %cst_17 {dimension_numbers = #tpu.dot_dimension_numbers<[1], [0], [0], [1], [0, 0, 1, 1], [], []>} : vector<16x128xf32>, vector<128x16xf32>, vector<16x16xf32> -> vector<16x16xf32>
    %20 = vector.extract_strided_slice %19 {offsets = [0, 0], sizes = [16, 4], strides = [1, 1]} : vector<16x16xf32> to vector<16x4xf32>
    %21 = vector.extract_strided_slice %19 {offsets = [0, 4], sizes = [16, 4], strides = [1, 1]} : vector<16x16xf32> to vector<16x4xf32>
    %22 = vector.extract_strided_slice %19 {offsets = [0, 8], sizes = [16, 4], strides = [1, 1]} : vector<16x16xf32> to vector<16x4xf32>
    %23 = vector.extract_strided_slice %19 {offsets = [0, 12], sizes = [16, 4], strides = [1, 1]} : vector<16x16xf32> to vector<16x4xf32>
    %24 = arith.maximumf %20, %21 : vector<16x4xf32>
    %25 = arith.maximumf %24, %22 : vector<16x4xf32>
    %26 = arith.maximumf %25, %23 : vector<16x4xf32>
    %27 = arith.subf %20, %26 : vector<16x4xf32>
    %cst_18 = arith.constant 5.000000e-01 : f32
    %28 = vector.broadcast %cst_18 : f32 to vector<16x4xf32>
    %29 = arith.mulf %27, %28 : vector<16x4xf32>
    %30 = arith.subf %21, %26 : vector<16x4xf32>
    %cst_19 = arith.constant 5.000000e-01 : f32
    %31 = vector.broadcast %cst_19 : f32 to vector<16x4xf32>
    %32 = arith.mulf %30, %31 : vector<16x4xf32>
    %33 = arith.subf %22, %26 : vector<16x4xf32>
    %cst_20 = arith.constant 5.000000e-01 : f32
    %34 = vector.broadcast %cst_20 : f32 to vector<16x4xf32>
    %35 = arith.mulf %33, %34 : vector<16x4xf32>
    %36 = arith.subf %23, %26 : vector<16x4xf32>
    %cst_21 = arith.constant 5.000000e-01 : f32
    %37 = vector.broadcast %cst_21 : f32 to vector<16x4xf32>
    %38 = arith.mulf %36, %37 : vector<16x4xf32>
    %39 = arith.maximumf %29, %32 : vector<16x4xf32>
    %40 = arith.minimumf %29, %32 : vector<16x4xf32>
    %41 = arith.maximumf %35, %38 : vector<16x4xf32>
    %42 = arith.minimumf %35, %38 : vector<16x4xf32>
    %43 = arith.maximumf %39, %41 : vector<16x4xf32>
    %44 = arith.minimumf %39, %41 : vector<16x4xf32>
    %45 = arith.maximumf %40, %42 : vector<16x4xf32>
    %46 = arith.minimumf %40, %42 : vector<16x4xf32>
    %47 = arith.maximumf %45, %44 : vector<16x4xf32>
    %48 = arith.minimumf %45, %44 : vector<16x4xf32>
    %cst_22 = arith.constant 0.000000e+00 : f32
    %49 = vector.broadcast %cst_22 : f32 to vector<16x4xf32>
    %cst_23 = arith.constant 0.000000e+00 : f32
    %50 = vector.broadcast %cst_23 : f32 to vector<16x4xf32>
    %51 = arith.addf %49, %43 : vector<16x4xf32>
    %52 = arith.mulf %43, %43 : vector<16x4xf32>
    %53 = arith.addf %50, %52 : vector<16x4xf32>
    %cst_24 = arith.constant 1.000000e+00 : f32
    %54 = vector.broadcast %cst_24 : f32 to vector<16x4xf32>
    %55 = arith.divf %51, %54 : vector<16x4xf32>
    %cst_25 = arith.constant 1.000000e+00 : f32
    %56 = vector.broadcast %cst_25 : f32 to vector<16x4xf32>
    %57 = arith.divf %53, %56 : vector<16x4xf32>
    %58 = arith.mulf %55, %55 : vector<16x4xf32>
    %59 = arith.subf %57, %58 : vector<16x4xf32>
    %cst_26 = arith.constant 1.000000e+00 : f32
    %60 = vector.broadcast %cst_26 : f32 to vector<16x4xf32>
    %61 = arith.mulf %60, %59 : vector<16x4xf32>
    %cst_27 = arith.constant 1.000000e+00 : f32
    %62 = vector.broadcast %cst_27 : f32 to vector<16x4xf32>
    %63 = arith.subf %62, %61 : vector<16x4xf32>
    %cst_28 = arith.constant 1.000000e+00 : f32
    %64 = vector.broadcast %cst_28 : f32 to vector<16x4xf32>
    %65 = arith.divf %63, %64 : vector<16x4xf32>
    %cst_29 = arith.constant 0.000000e+00 : f32
    %66 = vector.broadcast %cst_29 : f32 to vector<16x4xf32>
    %67 = arith.maximumf %65, %66 : vector<16x4xf32>
    %68 = math.sqrt %67 : vector<16x4xf32>
    %69 = arith.subf %55, %68 : vector<16x4xf32>
    %70 = arith.addf %51, %47 : vector<16x4xf32>
    %71 = arith.mulf %47, %47 : vector<16x4xf32>
    %72 = arith.addf %53, %71 : vector<16x4xf32>
    %cst_30 = arith.constant 2.000000e+00 : f32
    %73 = vector.broadcast %cst_30 : f32 to vector<16x4xf32>
    %74 = arith.divf %70, %73 : vector<16x4xf32>
    %cst_31 = arith.constant 2.000000e+00 : f32
    %75 = vector.broadcast %cst_31 : f32 to vector<16x4xf32>
    %76 = arith.divf %72, %75 : vector<16x4xf32>
    %77 = arith.mulf %74, %74 : vector<16x4xf32>
    %78 = arith.subf %76, %77 : vector<16x4xf32>
    %cst_32 = arith.constant 2.000000e+00 : f32
    %79 = vector.broadcast %cst_32 : f32 to vector<16x4xf32>
    %80 = arith.mulf %79, %78 : vector<16x4xf32>
    %cst_33 = arith.constant 1.000000e+00 : f32
    %81 = vector.broadcast %cst_33 : f32 to vector<16x4xf32>
    %82 = arith.subf %81, %80 : vector<16x4xf32>
    %cst_34 = arith.constant 2.000000e+00 : f32
    %83 = vector.broadcast %cst_34 : f32 to vector<16x4xf32>
    %84 = arith.divf %82, %83 : vector<16x4xf32>
    %cst_35 = arith.constant 0.000000e+00 : f32
    %85 = vector.broadcast %cst_35 : f32 to vector<16x4xf32>
    %86 = arith.maximumf %84, %85 : vector<16x4xf32>
    %87 = math.sqrt %86 : vector<16x4xf32>
    %88 = arith.subf %74, %87 : vector<16x4xf32>
    %89 = arith.addf %70, %48 : vector<16x4xf32>
    %90 = arith.mulf %48, %48 : vector<16x4xf32>
    %91 = arith.addf %72, %90 : vector<16x4xf32>
    %cst_36 = arith.constant 3.000000e+00 : f32
    %92 = vector.broadcast %cst_36 : f32 to vector<16x4xf32>
    %93 = arith.divf %89, %92 : vector<16x4xf32>
    %cst_37 = arith.constant 3.000000e+00 : f32
    %94 = vector.broadcast %cst_37 : f32 to vector<16x4xf32>
    %95 = arith.divf %91, %94 : vector<16x4xf32>
    %96 = arith.mulf %93, %93 : vector<16x4xf32>
    %97 = arith.subf %95, %96 : vector<16x4xf32>
    %cst_38 = arith.constant 3.000000e+00 : f32
    %98 = vector.broadcast %cst_38 : f32 to vector<16x4xf32>
    %99 = arith.mulf %98, %97 : vector<16x4xf32>
    %cst_39 = arith.constant 1.000000e+00 : f32
    %100 = vector.broadcast %cst_39 : f32 to vector<16x4xf32>
    %101 = arith.subf %100, %99 : vector<16x4xf32>
    %cst_40 = arith.constant 3.000000e+00 : f32
    %102 = vector.broadcast %cst_40 : f32 to vector<16x4xf32>
    %103 = arith.divf %101, %102 : vector<16x4xf32>
    %cst_41 = arith.constant 0.000000e+00 : f32
    %104 = vector.broadcast %cst_41 : f32 to vector<16x4xf32>
    %105 = arith.maximumf %103, %104 : vector<16x4xf32>
    %106 = math.sqrt %105 : vector<16x4xf32>
    %107 = arith.subf %93, %106 : vector<16x4xf32>
    %108 = arith.addf %89, %46 : vector<16x4xf32>
    %109 = arith.mulf %46, %46 : vector<16x4xf32>
    %110 = arith.addf %91, %109 : vector<16x4xf32>
    %cst_42 = arith.constant 4.000000e+00 : f32
    %111 = vector.broadcast %cst_42 : f32 to vector<16x4xf32>
    %112 = arith.divf %108, %111 : vector<16x4xf32>
    %cst_43 = arith.constant 4.000000e+00 : f32
    %113 = vector.broadcast %cst_43 : f32 to vector<16x4xf32>
    %114 = arith.divf %110, %113 : vector<16x4xf32>
    %115 = arith.mulf %112, %112 : vector<16x4xf32>
    %116 = arith.subf %114, %115 : vector<16x4xf32>
    %cst_44 = arith.constant 4.000000e+00 : f32
    %117 = vector.broadcast %cst_44 : f32 to vector<16x4xf32>
    %118 = arith.mulf %117, %116 : vector<16x4xf32>
    %cst_45 = arith.constant 1.000000e+00 : f32
    %119 = vector.broadcast %cst_45 : f32 to vector<16x4xf32>
    %120 = arith.subf %119, %118 : vector<16x4xf32>
    %cst_46 = arith.constant 4.000000e+00 : f32
    %121 = vector.broadcast %cst_46 : f32 to vector<16x4xf32>
    %122 = arith.divf %120, %121 : vector<16x4xf32>
    %cst_47 = arith.constant 0.000000e+00 : f32
    %123 = vector.broadcast %cst_47 : f32 to vector<16x4xf32>
    %124 = arith.maximumf %122, %123 : vector<16x4xf32>
    %125 = math.sqrt %124 : vector<16x4xf32>
    %126 = arith.subf %112, %125 : vector<16x4xf32>
    %cst_48 = arith.constant 0.000000e+00 : f32
    %127 = vector.broadcast %cst_48 : f32 to vector<16x4xf32>
    %128 = arith.cmpf ole, %69, %43 : vector<16x4xf32>
    %129 = arith.extui %128 : vector<16x4xi1> to vector<16x4xi32>
    %130 = arith.sitofp %129 : vector<16x4xi32> to vector<16x4xf32>
    %131 = arith.addf %127, %130 : vector<16x4xf32>
    %132 = arith.cmpf ole, %88, %47 : vector<16x4xf32>
    %133 = arith.extui %132 : vector<16x4xi1> to vector<16x4xi32>
    %134 = arith.sitofp %133 : vector<16x4xi32> to vector<16x4xf32>
    %135 = arith.addf %131, %134 : vector<16x4xf32>
    %136 = arith.cmpf ole, %107, %48 : vector<16x4xf32>
    %137 = arith.extui %136 : vector<16x4xi1> to vector<16x4xi32>
    %138 = arith.sitofp %137 : vector<16x4xi32> to vector<16x4xf32>
    %139 = arith.addf %135, %138 : vector<16x4xf32>
    %140 = arith.cmpf ole, %126, %46 : vector<16x4xf32>
    %141 = arith.extui %140 : vector<16x4xi1> to vector<16x4xi32>
    %142 = arith.sitofp %141 : vector<16x4xi32> to vector<16x4xf32>
    %143 = arith.addf %139, %142 : vector<16x4xf32>
    %cst_49 = arith.constant 0.000000e+00 : f32
    %144 = vector.broadcast %cst_49 : f32 to vector<16x4xf32>
    %cst_50 = arith.constant 1.000000e+00 : f32
    %145 = vector.broadcast %cst_50 : f32 to vector<16x4xf32>
    %146 = arith.cmpf oeq, %143, %145 : vector<16x4xf32>
    %cst_51 = arith.constant 0.000000e+00 : f32
    %147 = vector.broadcast %cst_51 : f32 to vector<16x4xf32>
    %148 = arith.select %146, %69, %147 : vector<16x4xi1>, vector<16x4xf32>
    %149 = arith.addf %144, %148 : vector<16x4xf32>
    %cst_52 = arith.constant 2.000000e+00 : f32
    %150 = vector.broadcast %cst_52 : f32 to vector<16x4xf32>
    %151 = arith.cmpf oeq, %143, %150 : vector<16x4xf32>
    %cst_53 = arith.constant 0.000000e+00 : f32
    %152 = vector.broadcast %cst_53 : f32 to vector<16x4xf32>
    %153 = arith.select %151, %88, %152 : vector<16x4xi1>, vector<16x4xf32>
    %154 = arith.addf %149, %153 : vector<16x4xf32>
    %cst_54 = arith.constant 3.000000e+00 : f32
    %155 = vector.broadcast %cst_54 : f32 to vector<16x4xf32>
    %156 = arith.cmpf oeq, %143, %155 : vector<16x4xf32>
    %cst_55 = arith.constant 0.000000e+00 : f32
    %157 = vector.broadcast %cst_55 : f32 to vector<16x4xf32>
    %158 = arith.select %156, %107, %157 : vector<16x4xi1>, vector<16x4xf32>
    %159 = arith.addf %154, %158 : vector<16x4xf32>
    %cst_56 = arith.constant 4.000000e+00 : f32
    %160 = vector.broadcast %cst_56 : f32 to vector<16x4xf32>
    %161 = arith.cmpf oeq, %143, %160 : vector<16x4xf32>
    %cst_57 = arith.constant 0.000000e+00 : f32
    %162 = vector.broadcast %cst_57 : f32 to vector<16x4xf32>
    %163 = arith.select %161, %126, %162 : vector<16x4xi1>, vector<16x4xf32>
    %164 = arith.addf %159, %163 : vector<16x4xf32>
    %165 = arith.subf %29, %164 : vector<16x4xf32>
    %cst_58 = arith.constant 0.000000e+00 : f32
    %166 = vector.broadcast %cst_58 : f32 to vector<16x4xf32>
    %167 = arith.maximumf %165, %166 : vector<16x4xf32>
    %168 = arith.mulf %167, %167 : vector<16x4xf32>
    %169 = arith.subf %32, %164 : vector<16x4xf32>
    %cst_59 = arith.constant 0.000000e+00 : f32
    %170 = vector.broadcast %cst_59 : f32 to vector<16x4xf32>
    %171 = arith.maximumf %169, %170 : vector<16x4xf32>
    %172 = arith.mulf %171, %171 : vector<16x4xf32>
    %173 = arith.subf %35, %164 : vector<16x4xf32>
    %cst_60 = arith.constant 0.000000e+00 : f32
    %174 = vector.broadcast %cst_60 : f32 to vector<16x4xf32>
    %175 = arith.maximumf %173, %174 : vector<16x4xf32>
    %176 = arith.mulf %175, %175 : vector<16x4xf32>
    %177 = arith.subf %38, %164 : vector<16x4xf32>
    %cst_61 = arith.constant 0.000000e+00 : f32
    %178 = vector.broadcast %cst_61 : f32 to vector<16x4xf32>
    %179 = arith.maximumf %177, %178 : vector<16x4xf32>
    %180 = arith.mulf %179, %179 : vector<16x4xf32>
    %181 = tpu.concatenate %168, %172, %176, %180 in 1 : vector<16x4xf32>, vector<16x4xf32>, vector<16x4xf32>, vector<16x4xf32> -> vector<16x16xf32>
    %c0_62 = arith.constant 0 : index
    %c0_63 = arith.constant 0 : index
    %182 = vector.load %arg8[%c0_62, %c0_63] : memref<16x128xf32, #tpu.memory_space<vmem>>, vector<16x128xf32>
    %cst_64 = arith.constant dense<0.000000e+00> : vector<16x128xf32>
    %183 = tpu.matmul %181, %182, %cst_64 {dimension_numbers = #tpu.dot_dimension_numbers<[1], [0], [0], [1], [0, 0, 1, 1], [], []>} : vector<16x16xf32>, vector<16x128xf32>, vector<16x128xf32> -> vector<16x128xf32>
    %184 = arith.mulf %183, %16 : vector<16x128xf32>
    %c0_65 = arith.constant 0 : index
    %c0_66 = arith.constant 0 : index
    %185 = vector.load %arg9[%c0_65, %c0_66] : memref<128x32xf32, #tpu.memory_space<vmem>>, vector<128x32xf32>
    %cst_67 = arith.constant dense<0.000000e+00> : vector<16x32xf32>
    %186 = tpu.matmul %184, %185, %cst_67 {dimension_numbers = #tpu.dot_dimension_numbers<[1], [0], [0], [1], [0, 0, 1, 1], [], []>} : vector<16x128xf32>, vector<128x32xf32>, vector<16x32xf32> -> vector<16x32xf32>
    %c0_68 = arith.constant 0 : index
    %c0_69 = arith.constant 0 : index
    %187 = vector.load %arg10[%c0_68, %c0_69] : memref<16x32xf32, #tpu.memory_space<vmem>>, vector<16x32xf32>
    tpu.vector_store %arg10[%c0_68, %c0_69], %186 {strides = array<i32>} : memref<16x32xf32, #tpu.memory_space<vmem>>, vector<16x32xf32>,
    return
  }
  func.func @transform_0(%arg0: i32) -> (i32, i32, i32) {
    %c0_i32 = arith.constant 0 : i32
    %c0_i32_0 = arith.constant 0 : i32
    %c0_i32_1 = arith.constant 0 : i32
    return %arg0, %c0_i32, %c0_i32_0 : i32, i32, i32
  }
  func.func @transform_1(%arg0: i32) -> (i32, i32) {
    %c0_i32 = arith.constant 0 : i32
    %c0_i32_0 = arith.constant 0 : i32
    return %arg0, %c0_i32 : i32, i32
  }
  func.func @transform_2(%arg0: i32) -> (i32, i32, i32) {
    %c0_i32 = arith.constant 0 : i32
    %c0_i32_0 = arith.constant 0 : i32
    %c0_i32_1 = arith.constant 0 : i32
    %c0_i32_2 = arith.constant 0 : i32
    return %c0_i32, %c0_i32_0, %c0_i32_1 : i32, i32, i32
  }
  func.func @transform_3(%arg0: i32) -> (i32, i32) {
    %c0_i32 = arith.constant 0 : i32
    %c0_i32_0 = arith.constant 0 : i32
    %c0_i32_1 = arith.constant 0 : i32
    return %c0_i32, %c0_i32_0 : i32, i32
  }
  func.func @transform_4(%arg0: i32) -> (i32, i32) {
    %c0_i32 = arith.constant 0 : i32
    %c0_i32_0 = arith.constant 0 : i32
    %c0_i32_1 = arith.constant 0 : i32
    return %c0_i32, %c0_i32_0 : i32, i32
  }
  func.func @transform_5(%arg0: i32) -> (i32, i32) {
    %c0_i32 = arith.constant 0 : i32
    %c0_i32_0 = arith.constant 0 : i32
    %c0_i32_1 = arith.constant 0 : i32
    return %c0_i32, %c0_i32_0 : i32, i32
  }
  func.func @transform_6(%arg0: i32) -> (i32, i32) {
    %c0_i32 = arith.constant 0 : i32
    %c0_i32_0 = arith.constant 0 : i32
    %c0_i32_1 = arith.constant 0 : i32
    return %c0_i32, %c0_i32_0 : i32, i32
  }
  func.func @transform_7(%arg0: i32) -> (i32, i32) {
    %c0_i32 = arith.constant 0 : i32
    %c0_i32_0 = arith.constant 0 : i32
    %c0_i32_1 = arith.constant 0 : i32
    return %c0_i32, %c0_i32_0 : i32, i32
  }
  func.func @transform_8(%arg0: i32) -> (i32, i32) {
    %c0_i32 = arith.constant 0 : i32
    %c0_i32_0 = arith.constant 0 : i32
    %c0_i32_1 = arith.constant 0 : i32
    return %c0_i32, %c0_i32_0 : i32, i32
  }
  func.func @transform_9(%arg0: i32) -> (i32, i32) {
    %c0_i32 = arith.constant 0 : i32
    %c0_i32_0 = arith.constant 0 : i32
    return %arg0, %c0_i32 : i32, i32
  }
}

</mosaic_0001>

<bundles_post_ra>
// kernel: tpu_custom_call.1
= control target key start
LH: loop header
LB: loop body
LE: loop exit
PB: predicated region body
PF: predicated region fallthrough
CT: control target
= control target key end

     0   :  { %vm46_vm0 = vcmask 130048   ;;  %s1413_s0 = inlined_call_operand.vmem [shape: bf16[2,16,32], index: 0, kind: input, shape index: {}]   ;;  %s1414_s1 = inlined_call_operand.vmem [shape: bf16[16,32], index: 1, kind: input, shape index: {}]   ;;  %s1415_s2 = inlined_call_operand.vmem [shape: bf16[2,8,16], index: 2, kind: input, shape index: {}]   ;;  %s1416_s3 = inlined_call_operand.vmem [shape: bf16[32,128], index: 3, kind: input, shape index: {}]   ;;  %s1417_s4 = inlined_call_operand.vmem [shape: bf16[32,256], index: 4, kind: input, shape index: {}]   ;;  %s1418_s5 = inlined_call_operand.vmem [shape: f32[16,384], index: 5, kind: input, shape index: {}]   ;;  %s1419_s6 = inlined_call_operand.vmem [shape: f32[128,16], index: 6, kind: input, shape index: {}]   ;;  %s1420_s7 = inlined_call_operand.vmem [shape: f32[16,128], index: 7, kind: input, shape index: {}]   ;;  %s1421_s8 = inlined_call_operand.vmem [shape: f32[128,32], index: 8, kind: input, shape index: {}]   ;;  %s1422_s9 = inlined_call_operand.hbm [shape: f32[16,32], index: 9, kind: output, shape index: {}]  }
   0x1   :  { %v800_v0 = vld [vmem:[%s1413_s0] sm:$0xff]  ;;  %v801_v1 = vld [vmem:[%s1413_s0 + $0x8] sm:$0xff]  ;;  %v782_v6 = vld [vmem:[%s1417_s4 + $0x10] sm:$0xf] }
   0x2   :  { %v38_v2 = vld [vmem:[%s1415_s2] sm:$0xf]  ;;  %v39_v3 = vld [vmem:[%s1415_s2 + $0x4] sm:$0xf]  ;;  %v804_v4 = vld [vmem:[%s1416_s3 + $0x8] sm:$0xff]  ;;  %57 = vmatpush.bf16.msra.mxu0 %v800_v0  ;;  %79 = vmatpush.bf16.msra.mxu1 %v801_v1 }
   0x3   :  { %v803_v5 = vld [vmem:[%s1416_s3] sm:$0xff]  ;;  %v808_v7 = vld [vmem:[%s1417_s4 + $0x14] sm:$0xf0]  ;;  %125 = vmatpush.bf16.msra.mxu2 %v804_v4  ;;  %v806_v10 = vld [vmem:[%s1417_s4 + $0x4] sm:$0xf0] }
   0x4   :  { %v783_v8 = vor.u32 %v808_v7, %v782_v6  ;;  %v774_v9 = vld [vmem:[%s1417_s4] sm:$0xf] }
   0x5   :  { %14 = vsyncpa [#allocation3], 0  ;;  %753 = vmatmul.msk.bf16.vlgmr.msra.gmra.mxu0 %vm46_vm0, %v38_v2  ;;  %758 = vmatmul.msk.bf16.vlgmr.msra.gmra.mxu1 %vm46_vm0, %v39_v3  ;;  %v802_v11 = vld [vmem:[%s1414_s1] sm:$0xff]  ;;  %v775_v12 = vor.u32 %v806_v10, %v774_v9  ;;  %vm115_vm1 = vcmask 261120   ;;  %v807_v13 = vld [vmem:[%s1417_s4 + $0x14] sm:$0xf] }
   0x6   :  { %166 = vmatpush.bf16.msrb.mxu0 %v783_v8  ;;  %v784_v14 = vld [vmem:[%s1417_s4 + $0x18] sm:$0xf0]  ;;  %v805_v15 = vld [vmem:[%s1417_s4 + $0x4] sm:$0xf]  ;;  %v776_v17 = vld [vmem:[%s1417_s4 + $0x8] sm:$0xf0] }
   0x7   :  { %126 = vmatpush.bf16.msra.mxu2 %v803_v5  ;;  %v787_v16 = vor.u32 %v807_v13, %v784_v14  ;;  %v779_v18 = vor.u32 %v805_v15, %v776_v17  ;;  %v205_v19 = vld [vmem:[%s1419_s6 + $0x78] sm:$0xff]  ;;  %v204_v20 = vld [vmem:[%s1419_s6 + $0x70] sm:$0xff]  ;;  %v203_v21 = vld [vmem:[%s1419_s6 + $0x68] sm:$0xff]  ;;  %s869_s24 = smov 116   ;;  %s870_s25 = smov 124  }
   0x8   :  { %206 = vmatpush.msrb.mxu1 %v205_v19  ;;  %v202_v22 = vld [vmem:[%s1419_s6 + $0x60] sm:$0xff]  ;;  %v201_v23 = vld [vmem:[%s1419_s6 + $0x58] sm:$0xff]  ;;  %v200_v24 = vld [vmem:[%s1419_s6 + $0x50] sm:$0xff]  ;;  %s871_s26 = smov 120   ;;  %s872_s3 = smov 12  }
   0x9   :  { %v199_v25 = vld [vmem:[%s1419_s6 + $0x48] sm:$0xff]  ;;  %v198_v26 = vld [vmem:[%s1419_s6 + $0x40] sm:$0xff]  ;;  %v197_v30 = vld [vmem:[%s1419_s6 + $0x38] sm:$0xff]  ;;  %s873_s27 = smov 4   ;;  %s874_s28 = smov 8  }
   0xa   :  { %771 = vmatmul.msk.bf16.vlgmr.msra.gmra.mxu2 %vm115_vm1, %v802_v11  ;;  %167 = vmatpush.bf16.msrb.mxu0 %v775_v12  ;;  %v196_v31 = vld [vmem:[%s1419_s6 + $0x30] sm:$0xff]  ;;  %v195_v32 = vld [vmem:[%s1419_s6 + $0x28] sm:$0xff]  ;;  %v194_v33 = vld [vmem:[%s1419_s6 + $0x20] sm:$0xff]  ;;  %s737_s4 = sshll.u32 %s1422_s9, 4  ;;  %s738_s4 = int_to_ptr.hbm [resolvable:$true] %s737_s4 }
   0xb   :  { %207 = vmatpush.msrb.mxu1 %v204_v20  ;;  %v193_v36 = vld [vmem:[%s1419_s6 + $0x18] sm:$0xff]  ;;  %v192_v37 = vld [vmem:[%s1419_s6 + $0x10] sm:$0xff]  ;;  %v191_v38 = vld [vmem:[%s1419_s6 + $0x8] sm:$0xff] }
   0xc   :  { %v190_v39 = vld [vmem:[%s1419_s6] sm:$0xff]  ;;  %v87_v42 = vld [vmem:[%s1418_s5 + $0x8] sm:$0xff]  ;;  %v89_v47 = vld [vmem:[%s1418_s5 + $0x18] sm:$0xff] }
   0xd   :  { %208 = vmatpush.msrb.mxu1 %v203_v21  ;;  %v86_v40 = vld [vmem:[%s1418_s5] sm:$0xff] }
   0xe   :  { %180 = vmatpush.bf16.msra.mxu0 %v787_v16  ;;  %v90_v49 = vld [vmem:[%s1418_s5 + $0x20] sm:$0xff] }
   0xf   :  { %209 = vmatpush.msrb.mxu1 %v202_v22 }
  0x11   :  { %210 = vmatpush.msrb.mxu1 %v201_v23 }
  0x12   :  { %181 = vmatpush.bf16.msra.mxu0 %v779_v18 }
  0x13   :  { %211 = vmatpush.msrb.mxu1 %v200_v24 }
  0x15   :  { %212 = vmatpush.msrb.mxu1 %v199_v25 }
  0x17   :  { %213 = vmatpush.msrb.mxu1 %v198_v26 }
  0x19   :  { %214 = vmatpush.msrb.mxu1 %v197_v30  ;;  %v877_v30 = vmov 4.0  }
  0x1b   :  { %215 = vmatpush.msrb.mxu1 %v196_v31 }
  0x1d   :  { %216 = vmatpush.msrb.mxu1 %v195_v32 }
  0x1f   :  { %217 = vmatpush.msrb.mxu1 %v194_v33 }
  0x21   :  { %218 = vmatpush.msrb.mxu1 %v193_v36 }
  0x23   :  { %219 = vmatpush.msrb.mxu1 %v192_v37 }
  0x25   :  { %220 = vmatpush.msrb.mxu1 %v191_v38 }
  0x27   :  { %221 = vmatpush.msrb.mxu1 %v190_v39 }
  0x82   :  { %v59_v27 = vpop.f32.mrf.mxu0  ;;  %v81_v28 = vpop.f32.mrf.mxu1 }
  0x83   :  { %v85_v29 = vpack.c.bf16 %v81_v28, %v59_v27  ;;  %v875_v28 = vmov 2.0  }
  0x84   :  { %821 = vrcp.f32 %v875_v28 }
  0x85   :  { %788 = vmatmul.msk.bf16.vlgmr.msrb.gmra.mxu0 %vm115_vm1, %v85_v29 }
  0x8a   :  { %v61_v34 = vpop.f32.mrf.mxu0  ;;  %v83_v35 = vpop.f32.mrf.mxu1 }
  0x8b   :  { %v822_v31 = vpop.eup %821 }
  0x8c   :  { %v390_v33 = vmul.f32 2.0, %v822_v31  ;;  %vm394_vm2 = vweird.f32 %v822_v31 }
  0x8d   :  { %v128_v41 = vpop.f32.mrf.mxu2 }
  0x8e   :  { %v129_v43 = vadd.f32 %v128_v41, %v86_v40  ;;  %v391_v36 = vsub.f32 1.0, %v390_v33 }
  0x90   :  { %v392_v41 = vmul.f32 %v822_v31, %v391_v36 }
  0x95   :  { %789 = vmatmul.msk.bf16.vlgmr.msra.gmra.mxu0 %vm115_vm1, %v85_v29  ;;  %v130_v48 = vpop.f32.mrf.mxu2  ;;  %v876_v29 = vmov 3.0  }
  0x96   :  { %v131_v51 = vadd.f32 %v130_v48, %v89_v47  ;;  %823 = vrcp.f32 %v876_v29  ;;  %v393_v48 = vadd.f32 %v822_v31, %v392_v41 }
  0x97   :  { %825 = vrcp.f32 %v877_v30 }
  0x9c   :  { %v824_v32 = vpop.eup %823 }
  0x9d   :  { %v826_v34 = vpop.eup %825  ;;  %v445_v35 = vmul.f32 3.0, %v824_v32  ;;  %vm449_vm3 = vweird.f32 %v824_v32 }
  0x9e   :  { %v500_v37 = vmul.f32 4.0, %v826_v34  ;;  %vm504_vm4 = vweird.f32 %v826_v34 }
  0x9f   :  { %v446_v39 = vsub.f32 1.0, %v445_v35 }
 0x102   :  { %v169_v44 = vpop.f32.mrf.mxu0 }
 0x103   :  { %v170_v45 = vadd.f32 %v169_v44, %v87_v42  ;;  %v501_v42 = vsub.f32 1.0, %v500_v37  ;;  %v447_v44 = vmul.f32 %v824_v32, %v446_v39 }
 0x105   :  { %v188_v46 = vmul.f32 %v170_v45, %v129_v43 }
 0x107   :  { %222 = vmatmul.f32.vlgmr.msrb.gmra.mxu1 %v188_v46 }
 0x10a   :  { %v171_v50 = vpop.f32.mrf.mxu0 }
 0x10b   :  { %v172_v52 = vadd.f32 %v171_v50, %v90_v49  ;;  %v502_v49 = vmul.f32 %v826_v34, %v501_v42 }
 0x10d   :  { %v189_v53 = vmul.f32 %v172_v52, %v131_v51 }
 0x10f   :  { %225 = vmatmul.f32.gmra.mxu1 %v189_v53 }
 0x184   :  { %v1041_v54 = vpop.f32.mrf.mxu1 }
 0x185   :  { %247 = vrot.lane.b32.xlu1 %v1041_v54, %s869_s24  ;;  %231 = vrot.lane.b32.xlu0 %v1041_v54, %s870_s25 }
 0x18c   :  { %v1046_v55 = vpop.f32.mrf.mxu1 }
 0x18d   :  { %239 = vrot.lane.b32.xlu0 %v1041_v54, %s871_s26  ;;  %241 = vrot.lane.b32.xlu2 %v1046_v55, %s871_s26 }
 0x18e   :  { %233 = vrot.lane.b32.xlu1 %v1046_v55, %s870_s25 }
 0x195   :  { %249 = vrot.lane.b32.xlu2 %v1046_v55, %s869_s24 }
 0x1e7   :  { %v242_v58 = vpop.permute.xlu2 %241 }
 0x1ef   :  { %v250_v2 = vpop.permute.xlu2 %249 }
 0x1f7   :  { %v248_v56 = vpop.permute.xlu1 %247  ;;  %v232_v57 = vpop.permute.xlu0 %231 }
 0x1f8   :  { %v237_v59 = vmax.f32 %v1041_v54, %v232_v57 }
 0x1ff   :  { %v240_v60 = vpop.permute.xlu0 %239 }
 0x200   :  { %v245_v61 = vmax.f32 %v237_v59, %v240_v60  ;;  %v234_v62 = vpop.permute.xlu1 %233  ;;  %v1123_v60 = vsel %vm394_vm2, %v822_v31, %v393_v48 }
 0x201   :  { %v238_v63 = vmax.f32 %v1046_v55, %v234_v62 }
 0x202   :  { %v1057_v0 = vmax.f32 %v245_v61, %v248_v56  ;;  %v448_v56 = vadd.f32 %v824_v32, %v447_v44  ;;  %v503_v61 = vadd.f32 %v826_v34, %v502_v49 }
 0x203   :  { %v246_v1 = vmax.f32 %v238_v63, %v242_v58 }
 0x204   :  { %281 = vrot.lane.b32.xlu0 %v1057_v0, %s872_s3  ;;  %261 = vrot.lane.b32.xlu2 %v1057_v0, %s873_s27  ;;  %v255_v38 = vsub.f32 %v1041_v54, %v1057_v0 }
 0x205   :  { %v1063_v3 = vmax.f32 %v246_v1, %v250_v2  ;;  %v1131_v2 = vsel %vm449_vm3, %v824_v32, %v448_v56 }
 0x206   :  { %v1109_v43 = vmul.f32 0.5, %v255_v38 }
 0x207   :  { %283 = vrot.lane.b32.xlu1 %v1063_v3, %s872_s3 }
 0x20c   :  { %271 = vrot.lane.b32.xlu0 %v1057_v0, %s874_s28  ;;  %263 = vrot.lane.b32.xlu2 %v1063_v3, %s873_s27 }
 0x214   :  { %273 = vrot.lane.b32.xlu0 %v1063_v3, %s874_s28 }
 0x25e   :  { %v262_v4 = vpop.permute.xlu2 %261 }
 0x25f   :  { %v267_v5 = vsub.f32 %v1041_v54, %v262_v4 }
 0x261   :  { %v1074_v6 = vmul.f32 0.5, %v267_v5 }
 0x263   :  { %293 = vrot.lane.b32.xlu2 %v1074_v6, %s870_s25 }
 0x266   :  { %v264_v7 = vpop.permute.xlu2 %263 }
 0x267   :  { %v268_v8 = vsub.f32 %v1046_v55, %v264_v7 }
 0x269   :  { %v1079_v9 = vmul.f32 0.5, %v268_v8 }
 0x26b   :  { %295 = vrot.lane.b32.xlu2 %v1079_v9, %s870_s25 }
 0x276   :  { %v282_v10 = vpop.permute.xlu0 %281 }
 0x277   :  { %v287_v11 = vsub.f32 %v1041_v54, %v282_v10 }
 0x279   :  { %v1084_v12 = vmul.f32 0.5, %v287_v11  ;;  %v284_v13 = vpop.permute.xlu1 %283 }
 0x27a   :  { %v288_v14 = vsub.f32 %v1046_v55, %v284_v13  ;;  %v1142_v13 = vsel %vm504_vm4, %v826_v34, %v503_v61 }
 0x27b   :  { %305 = vrot.lane.b32.xlu1 %v1084_v12, %s870_s25 }
 0x27c   :  { %v1089_v15 = vmul.f32 0.5, %v288_v14 }
 0x27e   :  { %v272_v16 = vpop.permute.xlu0 %271 }
 0x27f   :  { %v277_v17 = vsub.f32 %v1041_v54, %v272_v16  ;;  %v256_v54 = vsub.f32 %v1046_v55, %v1063_v3 }
 0x281   :  { %v1094_v18 = vmul.f32 0.5, %v277_v17  ;;  %v1129_v1 = vmul.f32 0.5, %v256_v54 }
 0x283   :  { %307 = vrot.lane.b32.xlu1 %v1089_v15, %s870_s25 }
 0x286   :  { %v274_v19 = vpop.permute.xlu0 %273 }
 0x287   :  { %v278_v23 = vsub.f32 %v1046_v55, %v274_v19 }
 0x289   :  { %v1101_v24 = vmul.f32 0.5, %v278_v23 }
 0x2bd   :  { %v294_v40 = vpop.permute.xlu2 %293 }
 0x2be   :  { %v299_v45 = vmax.f32 %v1109_v43, %v294_v40  ;;  %v301_v46 = vmin.f32 %v1109_v43, %v294_v40 }
 0x2c5   :  { %v296_v62 = vpop.permute.xlu2 %295 }
 0x2c6   :  { %v300_v11 = vmax.f32 %v1129_v1, %v296_v62 }
 0x2ed   :  { %v306_v20 = vpop.permute.xlu1 %305 }
 0x2ee   :  { %v311_v21 = vmax.f32 %v1094_v18, %v306_v20  ;;  %v313_v22 = vmin.f32 %v1094_v18, %v306_v20 }
 0x2f0   :  { %329 = vrot.lane.b32.xlu1 %v313_v22, %s871_s26  ;;  %317 = vrot.lane.b32.xlu0 %v311_v21, %s871_s26 }
 0x2f5   :  { %v308_v25 = vpop.permute.xlu1 %307 }
 0x2f6   :  { %v312_v26 = vmax.f32 %v1101_v24, %v308_v25  ;;  %v314_v27 = vmin.f32 %v1101_v24, %v308_v25 }
 0x2f8   :  { %331 = vrot.lane.b32.xlu1 %v314_v27, %s871_s26  ;;  %319 = vrot.lane.b32.xlu0 %v312_v26, %s871_s26  ;;  %v302_v27 = vmin.f32 %v1129_v1, %v296_v62 }
 0x362   :  { %v318_v47 = vpop.permute.xlu0 %317  ;;  %v330_v50 = vpop.permute.xlu1 %329 }
 0x363   :  { %v1113_v51 = vmax.f32 %v299_v45, %v318_v47  ;;  %v325_v52 = vmin.f32 %v299_v45, %v318_v47  ;;  %v335_v53 = vmax.f32 %v301_v46, %v330_v50  ;;  %v1133_v3 = vmin.f32 %v301_v46, %v330_v50 }
 0x365   :  { %v345_v57 = vmul.f32 %v1113_v51, %v1113_v51  ;;  %v1119_v58 = vmax.f32 %v335_v53, %v325_v52  ;;  %v1121_v59 = vmin.f32 %v335_v53, %v325_v52  ;;  %v495_v23 = vmul.f32 %v1133_v3, %v1133_v3 }
 0x367   :  { %v351_v63 = vsub.f32 %v345_v57, %v345_v57  ;;  %v383_v0 = vadd.f32 %v1119_v58, %v1113_v51  ;;  %v385_v55 = vmul.f32 %v1119_v58, %v1119_v58  ;;  %v440_v4 = vmul.f32 %v1121_v59, %v1121_v59 }
 0x369   :  { %v353_v5 = vsub.f32 1.0, %v351_v63  ;;  %v387_v7 = vadd.f32 %v385_v55, %v345_v57  ;;  %v1138_v8 = vmul.f32 %v1123_v60, %v383_v0  ;;  %v438_v10 = vadd.f32 %v383_v0, %v1121_v59 }
 0x36a   :  { %v320_v14 = vpop.permute.xlu0 %319  ;;  %v332_v26 = vpop.permute.xlu1 %331 }
 0x36b   :  { %v1144_v16 = vmax.f32 %v353_v5, 0.0  ;;  %v398_v17 = vmul.f32 %v1123_v60, %v387_v7  ;;  %v400_v19 = vmul.f32 %v1138_v8, %v1138_v8  ;;  %v442_v20 = vadd.f32 %v440_v4, %v387_v7 }
 0x36c   :  { %v1150_v21 = vmul.f32 %v1131_v2, %v438_v10  ;;  %v493_v22 = vadd.f32 %v438_v10, %v1133_v3  ;;  %v1155_v25 = vmax.f32 %v300_v11, %v320_v14  ;;  %v326_v28 = vmin.f32 %v300_v11, %v320_v14 }
 0x36d   :  { %827 = vrsqrt.f32 %v1144_v16  ;;  %v402_v29 = vsub.f32 %v398_v17, %v400_v19  ;;  %v453_v30 = vmul.f32 %v1131_v2, %v442_v20  ;;  %v497_v32 = vadd.f32 %v495_v23, %v442_v20 }
 0x36e   :  { %v455_v31 = vmul.f32 %v1150_v21, %v1150_v21  ;;  %v1163_v33 = vmul.f32 %v1142_v13, %v493_v22  ;;  %v346_v34 = vmul.f32 %v1155_v25, %v1155_v25  ;;  %v336_v35 = vmax.f32 %v302_v27, %v332_v26 }
 0x36f   :  { %v404_v36 = vmul.f32 2.0, %v402_v29  ;;  %v508_v38 = vmul.f32 %v1142_v13, %v497_v32  ;;  %v1189_v5 = vmin.f32 %v302_v27, %v332_v26  ;;  %vm364_vm5 = vcmp.eq.f32.partialorder %v1144_v16, inf }
 0x370   :  { %v457_v37 = vsub.f32 %v453_v30, %v455_v31  ;;  %v510_v39 = vmul.f32 %v1163_v33, %v1163_v33  ;;  %v352_v40 = vsub.f32 %v346_v34, %v346_v34  ;;  %v1170_v41 = vmax.f32 %v336_v35, %v326_v28 }
 0x371   :  { %v406_v42 = vsub.f32 1.0, %v404_v36  ;;  %v1178_v54 = vmin.f32 %v336_v35, %v326_v28  ;;  %v496_v26 = vmul.f32 %v1189_v5, %v1189_v5  ;;  %vm366_vm6 = vcmp.eq.f32.partialorder %v1144_v16, 0.0 }
 0x372   :  { %v459_v44 = vmul.f32 3.0, %v457_v37  ;;  %v512_v46 = vsub.f32 %v508_v38, %v510_v39  ;;  %v354_v47 = vsub.f32 1.0, %v352_v40  ;;  %v384_v48 = vadd.f32 %v1170_v41, %v1155_v25 }
 0x373   :  { %v828_v45 = vpop.eup %827  ;;  %v386_v49 = vmul.f32 %v1170_v41, %v1170_v41  ;;  %v408_v52 = vmul.f32 %v406_v42, %v1123_v60  ;;  %v441_v11 = vmul.f32 %v1178_v54, %v1178_v54 }
 0x374   :  { %v358_v50 = vmul.f32 %v828_v45, %v1144_v16  ;;  %v461_v53 = vsub.f32 1.0, %v459_v44  ;;  %v514_v56 = vmul.f32 4.0, %v512_v46  ;;  %v1180_v57 = vmax.f32 %v354_v47, 0.0 }
 0x375   :  { %v388_v61 = vadd.f32 %v386_v49, %v346_v34  ;;  %v1182_v63 = vmax.f32 %v408_v52, 0.0  ;;  %v1186_v55 = vmul.f32 %v1123_v60, %v384_v48  ;;  %v439_v10 = vadd.f32 %v384_v48, %v1178_v54 }
 0x376   :  { %v359_v62 = vmul.f32 %v828_v45, %v358_v50  ;;  %v463_v0 = vmul.f32 %v461_v53, %v1131_v2  ;;  %v516_v4 = vsub.f32 1.0, %v514_v56  ;;  %829 = vrsqrt.f32 %v1180_v57 }
 0x377   :  { %831 = vrsqrt.f32 %v1182_v63  ;;  %v399_v20 = vmul.f32 %v1123_v60, %v388_v61  ;;  %v401_v22 = vmul.f32 %v1186_v55, %v1186_v55  ;;  %v443_v23 = vadd.f32 %v441_v11, %v388_v61 }
 0x378   :  { %v360_v7 = vmul.f32 0.5, %v359_v62  ;;  %v1195_v14 = vmax.f32 %v463_v0, 0.0  ;;  %v518_v17 = vmul.f32 %v516_v4, %v1142_v13  ;;  %v1207_v30 = vmul.f32 %v1131_v2, %v439_v10 }
 0x379   :  { %v403_v29 = vsub.f32 %v399_v20, %v401_v22  ;;  %v494_v32 = vadd.f32 %v439_v10, %v1189_v5  ;;  %v498_v34 = vadd.f32 %v496_v26, %v443_v23  ;;  %v454_v37 = vmul.f32 %v1131_v2, %v443_v23 }
 0x37a   :  { %v361_v19 = vsub.f32 1.5, %v360_v7  ;;  %833 = vrsqrt.f32 %v1195_v14  ;;  %v1204_v28 = vmax.f32 %v518_v17, 0.0  ;;  %v456_v42 = vmul.f32 %v1207_v30, %v1207_v30 }
 0x37b   :  { %v405_v40 = vmul.f32 2.0, %v403_v29  ;;  %v1221_v44 = vmul.f32 %v1142_v13, %v494_v32  ;;  %v367_v61 = vand.u32 2147483648, %v1144_v16  ;;  %vm419_vm7 = vcmp.eq.f32.partialorder %v1182_v63, inf }
 0x37c   :  { %v362_v27 = vmul.f32 %v828_v45, %v361_v19  ;;  %v1209_v31 = vpop.eup %829  ;;  %835 = vrsqrt.f32 %v1204_v28  ;;  %v509_v45 = vmul.f32 %v1142_v13, %v498_v34  ;;  %v458_v53 = vsub.f32 %v454_v37, %v456_v42 }
 0x37d   :  { %v832_v35 = vpop.eup %831  ;;  %v370_v39 = vmul.f32 %v1209_v31, %v1180_v57  ;;  %v407_v49 = vsub.f32 1.0, %v405_v40  ;;  %v511_v56 = vmul.f32 %v1221_v44, %v1221_v44  ;;  %vm421_vm8 = vcmp.eq.f32.partialorder %v1182_v63, 0.0 }
 0x37e   :  { %v363_v36 = vmul.f32 %v362_v27, %v1144_v16  ;;  %v413_v38 = vmul.f32 %v832_v35, %v1182_v63  ;;  %v460_v10 = vmul.f32 3.0, %v458_v53  ;;  %v422_v37 = vand.u32 2147483648, %v1182_v63 }
 0x37f   :  { %v371_v48 = vmul.f32 %v1209_v31, %v370_v39  ;;  %v409_v0 = vmul.f32 %v407_v49, %v1123_v60  ;;  %v513_v11 = vsub.f32 %v509_v45, %v511_v56  ;;  %vm474_vm9 = vcmp.eq.f32.partialorder %v1195_v14, inf }
 0x380   :  { %v834_v46 = vpop.eup %833  ;;  %v414_v47 = vmul.f32 %v832_v35, %v413_v38  ;;  %v365_v50 = vsel %vm364_vm5, %v1144_v16, %v363_v36  ;;  %v462_v27 = vsub.f32 1.0, %v460_v10  ;;  %vm476_vm10 = vcmp.eq.f32.partialorder %v1195_v14, 0.0 }
 0x381   :  { %v468_v52 = vmul.f32 %v834_v46, %v1195_v14  ;;  %v368_v17 = vsel %vm366_vm6, %v367_v61, %v365_v50  ;;  %v372_v22 = vmul.f32 0.5, %v371_v48  ;;  %v1234_v26 = vmax.f32 %v409_v0, 0.0 }
 0x382   :  { %v415_v62 = vmul.f32 0.5, %v414_v47  ;;  %v836_v4 = vpop.eup %835  ;;  %v515_v29 = vmul.f32 4.0, %v513_v11  ;;  %v1238_v34 = vsub.f32 %v1113_v51, %v368_v17  ;;  %v477_v47 = vand.u32 2147483648, %v1195_v14 }
 0x383   :  { %v469_v7 = vmul.f32 %v834_v46, %v468_v52  ;;  %v523_v20 = vmul.f32 %v836_v4, %v1204_v28  ;;  %837 = vrsqrt.f32 %v1234_v26  ;;  %v373_v39 = vsub.f32 1.5, %v372_v22 }
 0x384   :  { %v416_v19 = vsub.f32 1.5, %v415_v62  ;;  %v517_v42 = vsub.f32 1.0, %v515_v29  ;;  %vm548_vm11 = vcmp.le.f32.partialorder %v1238_v34, %v1113_v51  ;;  %vm529_vm12 = vcmp.eq.f32.partialorder %v1204_v28, inf }
 0x385   :  { %v470_v23 = vmul.f32 0.5, %v469_v7  ;;  %v524_v60 = vmul.f32 %v836_v4, %v523_v20  ;;  %v374_v53 = vmul.f32 %v1209_v31, %v373_v39  ;;  %vm531_vm13 = vcmp.eq.f32.partialorder %v1204_v28, 0.0 }
 0x386   :  { %v417_v32 = vmul.f32 %v832_v35, %v416_v19  ;;  %v464_v35 = vmul.f32 %v462_v27, %v1131_v2  ;;  %v519_v56 = vmul.f32 %v517_v42, %v1142_v13  ;;  %v532_v31 = vand.u32 2147483648, %v1204_v28 }
 0x387   :  { %v471_v16 = vsub.f32 1.5, %v470_v23  ;;  %v525_v38 = vmul.f32 0.5, %v524_v60  ;;  %v878_v13 = vmov 0.0   ;;  %v375_v17 = vmul.f32 %v374_v53, %v1180_v57 }
 0x388   :  { %v418_v36 = vmul.f32 %v417_v32, %v1182_v63  ;;  %v1254_v50 = vmax.f32 %v464_v35, 0.0  ;;  %v790_v0 = vsel %vm548_vm11, 1.0, %v878_v13  ;;  %v1279_v19 = vmax.f32 %v519_v56, 0.0 }
 0x389   :  { %v472_v40 = vmul.f32 %v834_v46, %v471_v16  ;;  %v526_v48 = vsub.f32 1.5, %v525_v38  ;;  %v838_v61 = vpop.eup %837  ;;  %vm376_vm2 = vcmp.eq.f32.partialorder %v1180_v57, inf  ;;  %v379_v32 = vand.u32 2147483648, %v1180_v57 }
 0x38a   :  { %v420_v45 = vsel %vm419_vm7, %v1182_v63, %v418_v36  ;;  %839 = vrsqrt.f32 %v1254_v50  ;;  %v425_v10 = vmul.f32 %v838_v61, %v1234_v26  ;;  %v377_v27 = vsel %vm376_vm2, %v1180_v57, %v375_v17 }
 0x38b   :  { %v423_v49 = vsel %vm421_vm8, %v422_v37, %v420_v45  ;;  %v473_v46 = vmul.f32 %v472_v40, %v1195_v14  ;;  %v527_v52 = vmul.f32 %v836_v4, %v526_v48  ;;  %841 = vrsqrt.f32 %v1279_v19 }
 0x38c   :  { %v436_v2 = vsub.f32 %v1138_v8, %v423_v49  ;;  %v426_v20 = vmul.f32 %v838_v61, %v425_v10  ;;  %vm378_vm4 = vcmp.eq.f32.partialorder %v1180_v57, 0.0  ;;  %vm431_vm5 = vcmp.eq.f32.partialorder %v1234_v26, inf }
 0x38d   :  { %v475_v62 = vsel %vm474_vm9, %v1195_v14, %v473_v46  ;;  %v528_v8 = vmul.f32 %v527_v52, %v1204_v28  ;;  %v380_v36 = vsel %vm378_vm4, %v379_v32, %v377_v27  ;;  %vm433_vm6 = vcmp.eq.f32.partialorder %v1234_v26, 0.0 }
 0x38e   :  { %v478_v63 = vsel %vm476_vm10, %v477_v47, %v475_v62  ;;  %vm556_vm14 = vcmp.le.f32.partialorder %v436_v2, %v1119_v58  ;;  %v434_v57 = vand.u32 2147483648, %v1234_v26  ;;  %v382_v48 = vsub.f32 %v1155_v25, %v380_v36 }
 0x38f   :  { %v491_v4 = vsub.f32 %v1150_v21, %v478_v63  ;;  %v792_v7 = vsel %vm556_vm14, 1.0, %v878_v13  ;;  %v530_v14 = vsel %vm529_vm12, %v1204_v28, %v528_v8  ;;  %v427_v28 = vmul.f32 0.5, %v426_v20 }
 0x390   :  { %v562_v11 = vadd.f32 %v792_v7, %v790_v0  ;;  %v533_v58 = vsel %vm531_vm13, %v532_v31, %v530_v14  ;;  %v840_v21 = vpop.eup %839  ;;  %vm486_vm11 = vcmp.eq.f32.partialorder %v1254_v50, inf  ;;  %vm549_vm12 = vcmp.le.f32.partialorder %v382_v48, %v1155_v25 }
 0x391   :  { %vm564_vm15 = vcmp.le.f32.partialorder %v491_v4, %v1121_v59  ;;  %v546_v51 = vsub.f32 %v1163_v33, %v533_v58  ;;  %v480_v29 = vmul.f32 %v840_v21, %v1254_v50  ;;  %v428_v33 = vsub.f32 1.5, %v427_v28 }
 0x392   :  { %v794_v22 = vsel %vm564_vm15, 1.0, %v878_v13  ;;  %v489_v31 = vand.u32 2147483648, %v1254_v50  ;;  %vm488_vm14 = vcmp.eq.f32.partialorder %v1254_v50, 0.0  ;;  %v791_v25 = vsel %vm549_vm12, 1.0, %v878_v13 }
 0x393   :  { %v570_v23 = vadd.f32 %v794_v22, %v562_v11  ;;  %vm572_vm3 = vcmp.le.f32.partialorder %v546_v51, %v1133_v3  ;;  %v481_v16 = vmul.f32 %v840_v21, %v480_v29  ;;  %v429_v37 = vmul.f32 %v838_v61, %v428_v33  ;;  %v842_v3 = vpop.eup %841 }
 0x394   :  { %v796_v59 = vsel %vm572_vm3, 1.0, %v878_v13  ;;  %v535_v35 = vmul.f32 %v842_v3, %v1279_v19  ;;  %vm541_vm15 = vcmp.eq.f32.partialorder %v1279_v19, inf  ;;  %vm543_vm3 = vcmp.eq.f32.partialorder %v1279_v19, 0.0 }
 0x395   :  { %v578_v60 = vadd.f32 %v796_v59, %v570_v23  ;;  %v482_v38 = vmul.f32 0.5, %v481_v16  ;;  %v430_v40 = vmul.f32 %v429_v37, %v1234_v26  ;;  %v704_v16 = vld [vmem:[%s1421_s8 + $0x70] sm:$0xff] }
 0x396   :  { %v536_v46 = vmul.f32 %v842_v3, %v535_v35 }
 0x397   :  { %vm586_vm7 = vcmp.eq.f32.partialorder %v578_v60, 2.0  ;;  %vm580_vm8 = vcmp.eq.f32.partialorder %v578_v60, 1.0  ;;  %vm592_vm9 = vcmp.eq.f32.partialorder %v578_v60, 3.0  ;;  %v483_v45 = vsub.f32 1.5, %v482_v38  ;;  %v703_v38 = vld [vmem:[%s1421_s8 + $0x68] sm:$0xff] }
 0x398   :  { %v588_v39 = vsel %vm586_vm7, %v436_v2, 0.0  ;;  %v582_v42 = vsel %vm580_vm8, %v1238_v34, 0.0  ;;  %vm598_vm10 = vcmp.eq.f32.partialorder %v578_v60, 4.0  ;;  %v432_v49 = vsel %vm431_vm5, %v1234_v26, %v430_v40  ;;  %v705_v60 = vld [vmem:[%s1421_s8 + $0x78] sm:$0xff]  ;;  %v702_v40 = vld [vmem:[%s1421_s8 + $0x60] sm:$0xff] }
 0x399   :  { %v590_v47 = vadd.f32 %v588_v39, %v582_v42  ;;  %v594_v52 = vsel %vm592_vm9, %v491_v4, 0.0  ;;  %v435_v2 = vsel %vm433_vm6, %v434_v57, %v432_v49  ;;  %v484_v53 = vmul.f32 %v840_v21, %v483_v45  ;;  %706 = vmatpush.msra.mxu3 %v705_v60  ;;  %v701_v45 = vld [vmem:[%s1421_s8 + $0x58] sm:$0xff] }
 0x39a   :  { %v437_v34 = vsub.f32 %v1186_v55, %v435_v2  ;;  %v537_v61 = vmul.f32 0.5, %v536_v46  ;;  %v600_v62 = vsel %vm598_vm10, %v546_v51, 0.0  ;;  %vm648_vm9 = vcmask 31744   ;;  %v698_v2 = vld [vmem:[%s1421_s8 + $0x40] sm:$0xff] }
 0x39b   :  { %v596_v56 = vadd.f32 %v594_v52, %v590_v47  ;;  %v485_v63 = vmul.f32 %v484_v53, %v1254_v50  ;;  %707 = vmatpush.msra.mxu3 %v704_v16  ;;  %vm651_vm10 = vcmask 64512   ;;  %v699_v52 = vld [vmem:[%s1421_s8 + $0x48] sm:$0xff] }
 0x39c   :  { %v538_v0 = vsub.f32 1.5, %v537_v61  ;;  %vm557_vm13 = vcmp.le.f32.partialorder %v437_v34, %v1170_v41 }
 0x39d   :  { %v602_v8 = vadd.f32 %v600_v62, %v596_v56  ;;  %v487_v26 = vsel %vm486_vm11, %v1254_v50, %v485_v63  ;;  %v793_v55 = vsel %vm557_vm13, 1.0, %v878_v13  ;;  %v544_v50 = vand.u32 2147483648, %v1279_v19  ;;  %708 = vmatpush.msra.mxu3 %v703_v38  ;;  %v697_v56 = vld [vmem:[%s1421_s8 + $0x38] sm:$0xff]  ;;  %v695_v62 = vld [vmem:[%s1421_s8 + $0x28] sm:$0xff] }
 0x39e   :  { %v490_v4 = vsel %vm488_vm14, %v489_v31, %v487_v26  ;;  %v539_v7 = vmul.f32 %v842_v3, %v538_v0  ;;  %v563_v14 = vadd.f32 %v793_v55, %v791_v25  ;;  %vm654_vm11 = vcmask 97280   ;;  %v693_v0 = vld [vmem:[%s1421_s8 + $0x18] sm:$0xff] }
 0x39f   :  { %636 = vrot.lane.b32.xlu1 %v602_v8, %s872_s3  ;;  %624 = vrot.lane.b32.xlu0 %v602_v8, %s874_s28  ;;  %v492_v10 = vsub.f32 %v1207_v30, %v490_v4  ;;  %v604_v32 = vsub.f32 %v1109_v43, %v602_v8 }
 0x3a0   :  { %612 = vrot.lane.b32.xlu2 %v602_v8, %s873_s27  ;;  %v540_v41 = vmul.f32 %v539_v7, %v1279_v19  ;;  %709 = vmatpush.msra.mxu3 %v702_v40  ;;  %v694_v8 = vld [vmem:[%s1421_s8 + $0x20] sm:$0xff] }
 0x3a1   :  { %vm565_vm2 = vcmp.le.f32.partialorder %v492_v10, %v1178_v54  ;;  %v606_v36 = vmax.f32 %v604_v32, 0.0 }
 0x3a2   :  { %v542_v11 = vsel %vm541_vm15, %v1279_v19, %v540_v41  ;;  %v795_v17 = vsel %vm565_vm2, 1.0, %v878_v13  ;;  %710 = vmatpush.msra.mxu3 %v701_v45 }
 0x3a3   :  { %v545_v58 = vsel %vm543_vm3, %v544_v50, %v542_v11  ;;  %v571_v51 = vadd.f32 %v795_v17, %v563_v14  ;;  %v608_v57 = vmul.f32 %v606_v36, %v606_v36 }
 0x3a4   :  { %v547_v20 = vsub.f32 %v1221_v44, %v545_v58  ;;  %v657_v44 = vld [vmem:[%s1420_s7] sm:$0xff] }
 0x3a6   :  { %vm573_vm4 = vcmp.le.f32.partialorder %v547_v20, %v1189_v5  ;;  %v658_v5 = vld [vmem:[%s1420_s7 + $0x8] sm:$0xff] }
 0x3a7   :  { %v797_v30 = vsel %vm573_vm4, 1.0, %v878_v13  ;;  %679 = vmatpush.msrb.mxu2 %v658_v5 }
 0x3a8   :  { %v579_v22 = vadd.f32 %v797_v30, %v571_v51  ;;  %v88_v51 = vld [vmem:[%s1418_s5 + $0x10] sm:$0xff]  ;;  %v183_v30 = vpop.f32.mrf.mxu0 }
 0x3a9   :  { %680 = vmatpush.msrb.mxu2 %v657_v44 }
 0x3aa   :  { %vm587_vm5 = vcmp.eq.f32.partialorder %v579_v22, 2.0  ;;  %vm581_vm6 = vcmp.eq.f32.partialorder %v579_v22, 1.0  ;;  %vm593_vm7 = vcmp.eq.f32.partialorder %v579_v22, 3.0  ;;  %vm599_vm8 = vcmp.eq.f32.partialorder %v579_v22, 4.0 }
 0x3ab   :  { %v589_v21 = vsel %vm587_vm5, %v437_v34, 0.0  ;;  %v583_v54 = vsel %vm581_vm6, %v382_v48, 0.0  ;;  %v595_v28 = vsel %vm593_vm7, %v492_v10, 0.0  ;;  %v601_v27 = vsel %vm599_vm8, %v547_v20, 0.0  ;;  %v700_v48 = vld [vmem:[%s1421_s8 + $0x50] sm:$0xff]  ;;  %v690_v20 = vld [vmem:[%s1421_s8] sm:$0xff] }
 0x3ac   :  { %v591_v23 = vadd.f32 %v589_v21, %v583_v54  ;;  %711 = vmatpush.msra.mxu3 %v700_v48  ;;  %v696_v34 = vld [vmem:[%s1421_s8 + $0x30] sm:$0xff]  ;;  %v184_v22 = vadd.f32 %v183_v30, %v88_v51 }
 0x3ae   :  { %v597_v19 = vadd.f32 %v595_v28, %v591_v23  ;;  %712 = vmatpush.msra.mxu3 %v699_v52  ;;  %v91_v23 = vld [vmem:[%s1418_s5 + $0x28] sm:$0xff]  ;;  %s880_s5 = smov 128  }
 0x3b0   :  { %v603_v29 = vadd.f32 %v601_v27, %v597_v19  ;;  %713 = vmatpush.msra.mxu3 %v698_v2  ;;  %v185_v28 = vpop.f32.mrf.mxu0 }
 0x3b1   :  { %v186_v19 = vadd.f32 %v185_v28, %v91_v23 }
 0x3b2   :  { %638 = vrot.lane.b32.xlu1 %v603_v29, %s872_s3  ;;  %626 = vrot.lane.b32.xlu0 %v603_v29, %s874_s28  ;;  %v605_v63 = vsub.f32 %v1129_v1, %v603_v29  ;;  %v692_v1 = vld [vmem:[%s1421_s8 + $0x10] sm:$0xff] }
 0x3b3   :  { %614 = vrot.lane.b32.xlu2 %v603_v29, %s873_s27  ;;  %714 = vmatpush.msra.mxu3 %v697_v56 }
 0x3b4   :  { %v607_v26 = vmax.f32 %v605_v63, 0.0 }
 0x3b5   :  { %715 = vmatpush.msra.mxu3 %v696_v34 }
 0x3b6   :  { %v609_v14 = vmul.f32 %v607_v26, %v607_v26 }
 0x3b7   :  { %716 = vmatpush.msra.mxu3 %v695_v62 }
 0x3b9   :  { %717 = vmatpush.msra.mxu3 %v694_v8 }
 0x3bb   :  { %718 = vmatpush.msra.mxu3 %v693_v0 }
 0x3bd   :  { %719 = vmatpush.msra.mxu3 %v692_v1 }
 0x3fa   :  { %v613_v13 = vpop.permute.xlu2 %612 }
 0x3fb   :  { %v618_v59 = vsub.f32 %v1074_v6, %v613_v13 }
 0x3fd   :  { %v620_v33 = vmax.f32 %v618_v59, 0.0 }
 0x3ff   :  { %v622_v39 = vmul.f32 %v620_v33, %v620_v33 }
 0x40d   :  { %v615_v53 = vpop.permute.xlu2 %614 }
 0x40e   :  { %v619_v61 = vsub.f32 %v1079_v9, %v615_v53 }
 0x410   :  { %v621_v31 = vmax.f32 %v619_v61, 0.0 }
 0x411   :  { %v625_v37 = vpop.permute.xlu0 %624  ;;  %v637_v3 = vpop.permute.xlu1 %636 }
 0x412   :  { %v630_v6 = vsub.f32 %v1094_v18, %v625_v37  ;;  %v642_v43 = vsub.f32 %v1084_v12, %v637_v3  ;;  %v649_v12 = vsel %vm648_vm9, %v608_v57, %v622_v39  ;;  %v623_v25 = vmul.f32 %v621_v31, %v621_v31 }
 0x414   :  { %v632_v35 = vmax.f32 %v630_v6, 0.0  ;;  %v644_v42 = vmax.f32 %v642_v43, 0.0  ;;  %v650_v17 = vsel %vm648_vm9, %v609_v14, %v623_v25 }
 0x416   :  { %v634_v47 = vmul.f32 %v632_v35, %v632_v35  ;;  %v646_v18 = vmul.f32 %v644_v42, %v644_v42 }
 0x418   :  { %v652_v49 = vsel %vm651_vm10, %v649_v12, %v634_v47 }
 0x419   :  { %v655_v46 = vsel %vm654_vm11, %v652_v49, %v646_v18 }
 0x41a   :  { %798 = vmatmul.msk.f32.vlgmr.msrb.gmra.mxu2 %vm46_vm0, %v655_v46 }
 0x424   :  { %v639_v9 = vpop.permute.xlu1 %638  ;;  %v627_v55 = vpop.permute.xlu0 %626 }
 0x425   :  { %v643_v4 = vsub.f32 %v1089_v15, %v639_v9  ;;  %v631_v7 = vsub.f32 %v1101_v24, %v627_v55  ;;  %v691_v24 = vld [vmem:[%s1421_s8 + $0x8] sm:$0xff]  ;;  %s879_s8 = smov [#allocation2]  }
 0x426   :  { %720 = vmatpush.msra.mxu3 %v691_v24  ;;  %s735_s19 = sshll.u32 %s879_s8, 4  ;;  %s736_s19 = int_to_ptr.vmem [resolvable:$true] %s735_s19 }
 0x427   :  { %v645_v10 = vmax.f32 %v643_v4, 0.0  ;;  %v633_v41 = vmax.f32 %v631_v7, 0.0 }
 0x428   :  { %721 = vmatpush.msra.mxu3 %v690_v20 }
 0x429   :  { %v647_v50 = vmul.f32 %v645_v10, %v645_v10  ;;  %v635_v11 = vmul.f32 %v633_v41, %v633_v41 }
 0x42b   :  { %v653_v58 = vsel %vm651_vm10, %v650_v17, %v635_v11 }
 0x42c   :  { %v656_v15 = vsel %vm654_vm11, %v653_v58, %v647_v50 }
 0x42d   :  { %799 = vmatmul.msk.f32.gmra.mxu2 %vm46_vm0, %v656_v15 }
 0x49d   :  { %v682_v21 = vpop.f32.mrf.mxu2 }
 0x49e   :  { %v688_v54 = vmul.f32 %v682_v21, %v184_v22 }
 0x4a0   :  { %722 = vmatmul.f32.vlgmr.msra.gmra.mxu3 %v688_v54 }
 0x4b0   :  { %v685_v27 = vpop.f32.mrf.mxu2 }
 0x4b1   :  { %v689_v29 = vmul.f32 %v685_v27, %v186_v19 }
 0x4b3   :  { %725 = vmatmul.f32.gmra.mxu3 %v689_v29 }
 0x523   :  { %v723_v5 = vpop.f32.mrf.mxu3 }
 0x524   :  { %729 = vst.msk [vmem:[#allocation2] sm:$0xff] %vm115_vm1, %v723_v5 }
 0x536   :  { %v726_v44 = vpop.f32.mrf.mxu3 }
 0x537   :  { %730 = vst.msk [vmem:[#allocation2 + $0x8] sm:$0xff] %vm115_vm1, %v726_v44 }
 0x538   :  { %743 = dma.vmem_to_hbm [thread:$0]  %s736_s19, 256, %s738_s4, [#allocation3], %s880_s5, %s880_s5, %s874_s28  }
 0x539   :  { %867 = dma.done.wait [#allocation3], 256  }
 0x53a   :  { %868 = vsyncadd [#allocation3], 4294967040 }
 0x53b   :  { %748 = vsyncpa [#allocation3], 1 }

</bundles_post_ra>
